<compile_context>
chip_gen: v6e
topology: v6e:2x2x1
jax: 0.10.0
libtpu: 0.0.40
codegen_flags: <defaults>
</compile_context>

<pallas_src>
import functools

import jax
import jax.numpy as jnp
from jax.experimental import pallas as pl
from jax.experimental.pallas import tpu as pltpu

LANES = 128                  # TPU lane width
DEFAULT_BLOCK_BATCH = 1024   # max rows per grid step (tiny VMEM footprint even here)


def _round_up(x, m):
    return ((x + m - 1) // m) * m


def _choose_batch_tiling(batch, block_batch):
    """Return (tile_batch, padded_batch). Even tile count for v7x megacore balance."""
    if batch <= 8:
        # tiny latency path (act()): single tile == full (unpadded) batch
        return batch, batch
    num_tiles = max(2, pl.cdiv(batch, block_batch))
    if num_tiles % 2:
        num_tiles += 1                       # even split across 2 TensorCores (v7x)
    tb = _round_up(pl.cdiv(batch, num_tiles), 8)
    padded_batch = _round_up(batch, tb)
    return tb, padded_batch


# ---------------------------------------------------------------------------
# Kernels
# ---------------------------------------------------------------------------
def _mlp_body(x_ref, w1_ref, b1_ref, w2_ref, b2_ref, w3_ref, b3_ref, w4_ref, b4_ref):
    """Fused 4-layer MLP on one (tb, in_dim) activation tile.

    Weights may be bf16 (pre-cast once, outside the kernel); accumulation is f32.
    Returns (tb, n_pad) float32 with the last layer lane-padded to 128.
    """
    wdt = w1_ref.dtype  # bf16 or f32; activations are cast to match MXU operands

    h = x_ref[...].astype(wdt)
    h = jnp.dot(h, w1_ref[...], preferred_element_type=jnp.float32) + b1_ref[...]
    h = jnp.maximum(h, 0.0).astype(wdt)

    h = jnp.dot(h, w2_ref[...], preferred_element_type=jnp.float32) + b2_ref[...]
    h = jnp.maximum(h, 0.0).astype(wdt)

    h = jnp.dot(h, w3_ref[...], preferred_element_type=jnp.float32) + b3_ref[...]
    h = jnp.maximum(h, 0.0).astype(wdt)

    h = jnp.dot(h, w4_ref[...], preferred_element_type=jnp.float32) + b4_ref[...]
    return h  # (tb, n_pad) float32


def _qnetwork_kernel(x_ref, w1_ref, b1_ref, w2_ref, b2_ref, w3_ref, b3_ref,
                     w4_ref, b4_ref, o_ref, *, n_action):
    h = _mlp_body(x_ref, w1_ref, b1_ref, w2_ref, b2_ref, w3_ref, b3_ref, w4_ref, b4_ref)
    # Unpadded store: only the real n_action Q-values go back to HBM.
    o_ref[...] = h[:, :n_action].astype(o_ref.dtype)


def _qnetwork_act_kernel(x_ref, w1_ref, b1_ref, w2_ref, b2_ref, w3_ref, b3_ref,
                         w4_ref, b4_ref, a_ref, *, n_action, n_pad):
    h = _mlp_body(x_ref, w1_ref, b1_ref, w2_ref, b2_ref, w3_ref, b3_ref, w4_ref, b4_ref)
    # First-index argmax over the real action lanes, done on the full 128-lane vreg.
    idx = jax.lax.broadcasted_iota(jnp.int32, h.shape, 1)
    valid = idx < n_action
    qm = jnp.where(valid, h, -jnp.inf)
    max_q = jnp.max(qm, axis=-1, keepdims=True)
    cand = jnp.where(qm >= max_q, idx, jnp.int32(n_pad))
    a_ref[...] = jnp.min(cand, axis=-1, keepdims=True).astype(jnp.int32)


# ---------------------------------------------------------------------------
# Wrappers
# ---------------------------------------------------------------------------
def prepare_qnetwork_params(params, use_bf16=True):
    """One-time parameter prep (hoisted out of the per-call path).

    Pads the last layer's weight/bias to 128 lanes (lane-dense in-kernel compute)
    and pre-casts weights to bf16 for the MXU (f32 accumulation in-kernel).
    Biases are kept f32 for accurate accumulation. Returns (prepared, n_action).
    """
    n_action = params["w4"].shape[1]
    n_pad = _round_up(max(n_action, 1), LANES)
    wdt = jnp.bfloat16 if use_bf16 else jnp.float32

    w4 = jnp.pad(params["w4"], ((0, 0), (0, n_pad - n_action)))
    b4 = jnp.pad(params["b4"], ((0, 0), (0, n_pad - n_action)))

    prepared = {
        "w1": params["w1"].astype(wdt), "b1": params["b1"].astype(jnp.float32),
        "w2": params["w2"].astype(wdt), "b2": params["b2"].astype(jnp.float32),
        "w3": params["w3"].astype(wdt), "b3": params["b3"].astype(jnp.float32),
        "w4": w4.astype(wdt),           "b4": b4.astype(jnp.float32),
    }
    return prepared, n_action


def _mlp_pallas_call(kernel, x, prepared, out_width, out_dtype, block_batch):
    batch, input_dim = x.shape
    tb, padded_batch = _choose_batch_tiling(batch, block_batch)
    if padded_batch != batch:
        x = jnp.pad(x, ((0, padded_batch - batch), (0, 0)))
    grid = (padded_batch // tb,)

    def resident(arr):
        # Full-array block with constant block index -> stays VMEM-resident
        # across all grid steps (~30 KB of bf16 weights + ~1.4 KB f32 biases).
        return pl.BlockSpec(arr.shape, lambda i: (0, 0))

    names = ("w1", "b1", "w2", "b2", "w3", "b3", "w4", "b4")
    in_specs = [pl.BlockSpec((tb, input_dim), lambda i: (i, 0))]   # streamed activations
    in_specs += [resident(prepared[n]) for n in names]

    out = pl.pallas_call(
        kernel,
        out_shape=jax.ShapeDtypeStruct((padded_batch, out_width), out_dtype),
        grid=grid,
        in_specs=in_specs,
        out_specs=pl.BlockSpec((tb, out_width), lambda i: (i, 0)),  # unpadded output
        compiler_params=pltpu.CompilerParams(
            dimension_semantics=("parallel",),  # megacore sharding on v7x
        ),
    )(x, *(prepared[n] for n in names))

    return out[:batch]


@functools.partial(jax.jit, static_argnames=("n_action", "block_batch"))
def qnetwork_forward(x, prepared, *, n_action, block_batch=DEFAULT_BLOCK_BATCH):
    """x: (batch, input_dim) float32 -> (batch, n_action) float32 Q-values."""
    kernel = functools.partial(_qnetwork_kernel, n_action=n_action)
    return _mlp_pallas_call(kernel, x, prepared, n_action, jnp.float32, block_batch)


@functools.partial(jax.jit, static_argnames=("n_action", "block_batch"))
def qnetwork_actions(x, prepared, *, n_action, block_batch=DEFAULT_BLOCK_BATCH):
    """act()-style path: per-row argmax over Q-values, computed in-kernel.

    Emits 4 B/row (int32 action) instead of Q-values -> essentially no output
    HBM traffic and no separate host-side argmax pass.
    """
    n_pad = prepared["w4"].shape[1]
    kernel = functools.partial(_qnetwork_act_kernel, n_action=n_action, n_pad=n_pad)
    out = _mlp_pallas_call(kernel, x, prepared, 1, jnp.int32, block_batch)
    return out[:, 0]


# ---------------------------------------------------------------------------
# Init + reference
# ---------------------------------------------------------------------------
def init_qnetwork_params(key, input_dim, n_action):
    """PyTorch-style init: U(-1/sqrt(fan_in), 1/sqrt(fan_in)); weights stored (in, out)."""
    dims = [input_dim, 128, 64, 32, n_action]
    params = {}
    for i in range(4):
        fan_in, fan_out = dims[i], dims[i + 1]
        key, kw, kb = jax.random.split(key, 3)
        bound = 1.0 / jnp.sqrt(jnp.float32(fan_in))
        params[f"w{i + 1}"] = jax.random.uniform(
            kw, (fan_in, fan_out), jnp.float32, -bound, bound)
        params[f"b{i + 1}"] = jax.random.uniform(
            kb, (1, fan_out), jnp.float32, -bound, bound)
    return params


def qnetwork_ref(x, params):
    """Plain-JAX reference for correctness checking."""
    h = jnp.maximum(x @ params["w1"] + params["b1"], 0.0)
    h = jnp.maximum(h @ params["w2"] + params["b2"], 0.0)
    h = jnp.maximum(h @ params["w3"] + params["b3"], 0.0)
    return h @ params["w4"] + params["b4"]


if __name__ == "__main__":
    key = jax.random.PRNGKey(0)
    batch, input_dim, n_action = 2, 8, 4

    key, kx = jax.random.split(key)
    x = jax.random.normal(kx, (batch, input_dim), jnp.float32)
    params = init_qnetwork_params(key, input_dim, n_action)
    ref = qnetwork_ref(x, params)

    # --- exact f32 path (small batch / act() latency case, single tile) ---
    prep_f32, na = prepare_qnetwork_params(params, use_bf16=False)
    out = qnetwork_forward(x, prep_f32, n_action=na)
    jax.block_until_ready(out)
    assert out.shape == (batch, n_action)
    assert jnp.allclose(out, ref, atol=1e-4, rtol=1e-4), "f32 small-batch mismatch"

    # --- default bf16-weight path (f32 accumulation); looser tolerance ---
    prep_bf16, _ = prepare_qnetwork_params(params, use_bf16=True)
    out16 = qnetwork_forward(x, prep_bf16, n_action=na)
    jax.block_until_ready(out16)
    assert jnp.allclose(out16, ref, atol=5e-2, rtol=5e-2), "bf16 path mismatch"

    # --- larger batch: balanced grid=(2,) tiles of 320 rows (v7x megacore) ---
    key, kx2 = jax.random.split(key)
    xb = jax.random.normal(kx2, (640, input_dim), jnp.float32)
    refb = qnetwork_ref(xb, params)
    outb = qnetwork_forward(xb, prep_f32, n_action=na)
    jax.block_until_ready(outb)
    assert outb.shape == (640, n_action)
    assert jnp.allclose(outb, refb, atol=1e-4, rtol=1e-4), "batched mismatch"

    # --- act() equivalent: in-kernel argmax, one int32 per row ---
    acts = qnetwork_actions(x, prep_f32, n_action=na)
    jax.block_until_ready(acts)
    assert acts.shape == (batch,)
    assert jnp.array_equal(acts, jnp.argmax(ref, axis=-1).astype(jnp.int32)), "argmax mismatch"
    # Single-observation act() (torch flat-argmax is per-row argmax at batch=1):
    _ = int(qnetwork_actions(x[:1], prep_f32, n_action=na)[0])

    print("KERNEL_OK")
</pallas_src>

<mosaic_0001>
module attributes {stable_mosaic.version = 11 : i64} {
  func.func @_qnetwork_kernel(%arg0: i32, %arg1: memref<2x8xf32, #tpu.memory_space<vmem>>, %arg2: memref<8x128xf32, #tpu.memory_space<vmem>>, %arg3: memref<1x128xf32, #tpu.memory_space<vmem>>, %arg4: memref<128x64xf32, #tpu.memory_space<vmem>>, %arg5: memref<1x64xf32, #tpu.memory_space<vmem>>, %arg6: memref<64x32xf32, #tpu.memory_space<vmem>>, %arg7: memref<1x32xf32, #tpu.memory_space<vmem>>, %arg8: memref<32x128xf32, #tpu.memory_space<vmem>>, %arg9: memref<1x128xf32, #tpu.memory_space<vmem>>, %arg10: memref<2x4xf32, #tpu.memory_space<vmem>>) attributes {dimension_semantics = [#tpu.dimension_semantics<parallel>], iteration_bounds = array<i64: 1>, scalar_prefetch = 0 : i64, scratch_operands = 0 : i64, tpu.core_type = #tpu.core_type<tc>, window_params = [{transform_indices = @transform_0, window_bounds = array<i64: 2, 8>}, {pipeline_mode = #tpu.pipeline_mode<synchronous>, transform_indices = @transform_1, window_bounds = array<i64: 8, 128>}, {pipeline_mode = #tpu.pipeline_mode<synchronous>, transform_indices = @transform_2, window_bounds = array<i64: 1, 128>}, {pipeline_mode = #tpu.pipeline_mode<synchronous>, transform_indices = @transform_3, window_bounds = array<i64: 128, 64>}, {pipeline_mode = #tpu.pipeline_mode<synchronous>, transform_indices = @transform_4, window_bounds = array<i64: 1, 64>}, {pipeline_mode = #tpu.pipeline_mode<synchronous>, transform_indices = @transform_5, window_bounds = array<i64: 64, 32>}, {pipeline_mode = #tpu.pipeline_mode<synchronous>, transform_indices = @transform_6, window_bounds = array<i64: 1, 32>}, {pipeline_mode = #tpu.pipeline_mode<synchronous>, transform_indices = @transform_7, window_bounds = array<i64: 32, 128>}, {pipeline_mode = #tpu.pipeline_mode<synchronous>, transform_indices = @transform_8, window_bounds = array<i64: 1, 128>}, {transform_indices = @transform_9, window_bounds = array<i64: 2, 4>}]} {
    %c0 = arith.constant 0 : index
    %c0_0 = arith.constant 0 : index
    %0 = vector.load %arg1[%c0, %c0_0] : memref<2x8xf32, #tpu.memory_space<vmem>>, vector<2x8xf32>
    %c0_1 = arith.constant 0 : index
    %c0_2 = arith.constant 0 : index
    %1 = vector.load %arg2[%c0_1, %c0_2] : memref<8x128xf32, #tpu.memory_space<vmem>>, vector<8x128xf32>
    %cst = arith.constant dense<0.000000e+00> : vector<2x128xf32>
    %2 = tpu.matmul %0, %1, %cst {dimension_numbers = #tpu.dot_dimension_numbers<[1], [0], [0], [1], [0, 0, 1, 1], [], []>} : vector<2x8xf32>, vector<8x128xf32>, vector<2x128xf32> -> vector<2x128xf32>
    %c0_3 = arith.constant 0 : index
    %c0_4 = arith.constant 0 : index
    %3 = vector.load %arg3[%c0_3, %c0_4] : memref<1x128xf32, #tpu.memory_space<vmem>>, vector<1x128xf32>
    %4 = vector.broadcast %3 : vector<1x128xf32> to vector<2x128xf32>
    %5 = arith.addf %2, %4 : vector<2x128xf32>
    %cst_5 = arith.constant 0.000000e+00 : f32
    %6 = vector.broadcast %cst_5 : f32 to vector<2x128xf32>
    %7 = arith.maximumf %5, %6 : vector<2x128xf32>
    %c0_6 = arith.constant 0 : index
    %c0_7 = arith.constant 0 : index
    %8 = vector.load %arg4[%c0_6, %c0_7] : memref<128x64xf32, #tpu.memory_space<vmem>>, vector<128x64xf32>
    %cst_8 = arith.constant dense<0.000000e+00> : vector<2x64xf32>
    %9 = tpu.matmul %7, %8, %cst_8 {dimension_numbers = #tpu.dot_dimension_numbers<[1], [0], [0], [1], [0, 0, 1, 1], [], []>} : vector<2x128xf32>, vector<128x64xf32>, vector<2x64xf32> -> vector<2x64xf32>
    %c0_9 = arith.constant 0 : index
    %c0_10 = arith.constant 0 : index
    %10 = vector.load %arg5[%c0_9, %c0_10] : memref<1x64xf32, #tpu.memory_space<vmem>>, vector<1x64xf32>
    %11 = vector.broadcast %10 : vector<1x64xf32> to vector<2x64xf32>
    %12 = arith.addf %9, %11 : vector<2x64xf32>
    %cst_11 = arith.constant 0.000000e+00 : f32
    %13 = vector.broadcast %cst_11 : f32 to vector<2x64xf32>
    %14 = arith.maximumf %12, %13 : vector<2x64xf32>
    %c0_12 = arith.constant 0 : index
    %c0_13 = arith.constant 0 : index
    %15 = vector.load %arg6[%c0_12, %c0_13] : memref<64x32xf32, #tpu.memory_space<vmem>>, vector<64x32xf32>
    %cst_14 = arith.constant dense<0.000000e+00> : vector<2x32xf32>
    %16 = tpu.matmul %14, %15, %cst_14 {dimension_numbers = #tpu.dot_dimension_numbers<[1], [0], [0], [1], [0, 0, 1, 1], [], []>} : vector<2x64xf32>, vector<64x32xf32>, vector<2x32xf32> -> vector<2x32xf32>
    %c0_15 = arith.constant 0 : index
    %c0_16 = arith.constant 0 : index
    %17 = vector.load %arg7[%c0_15, %c0_16] : memref<1x32xf32, #tpu.memory_space<vmem>>, vector<1x32xf32>
    %18 = vector.broadcast %17 : vector<1x32xf32> to vector<2x32xf32>
    %19 = arith.addf %16, %18 : vector<2x32xf32>
    %cst_17 = arith.constant 0.000000e+00 : f32
    %20 = vector.broadcast %cst_17 : f32 to vector<2x32xf32>
    %21 = arith.maximumf %19, %20 : vector<2x32xf32>
    %c0_18 = arith.constant 0 : index
    %c0_19 = arith.constant 0 : index
    %22 = vector.load %arg8[%c0_18, %c0_19] : memref<32x128xf32, #tpu.memory_space<vmem>>, vector<32x128xf32>
    %cst_20 = arith.constant dense<0.000000e+00> : vector<2x128xf32>
    %23 = tpu.matmul %21, %22, %cst_20 {dimension_numbers = #tpu.dot_dimension_numbers<[1], [0], [0], [1], [0, 0, 1, 1], [], []>} : vector<2x32xf32>, vector<32x128xf32>, vector<2x128xf32> -> vector<2x128xf32>
    %c0_21 = arith.constant 0 : index
    %c0_22 = arith.constant 0 : index
    %24 = vector.load %arg9[%c0_21, %c0_22] : memref<1x128xf32, #tpu.memory_space<vmem>>, vector<1x128xf32>
    %25 = vector.broadcast %24 : vector<1x128xf32> to vector<2x128xf32>
    %26 = arith.addf %23, %25 : vector<2x128xf32>
    %27 = vector.extract_strided_slice %26 {offsets = [0, 0], sizes = [2, 4], strides = [1, 1]} : vector<2x128xf32> to vector<2x4xf32>
    %c0_23 = arith.constant 0 : index
    %c0_24 = arith.constant 0 : index
    %28 = vector.load %arg10[%c0_23, %c0_24] : memref<2x4xf32, #tpu.memory_space<vmem>>, vector<2x4xf32>
    tpu.vector_store %arg10[%c0_23, %c0_24], %27 {strides = array<i32>} : memref<2x4xf32, #tpu.memory_space<vmem>>, vector<2x4xf32>,
    return
  }
  func.func @transform_0(%arg0: i32) -> (i32, i32) {
    %c0_i32 = arith.constant 0 : i32
    %c0_i32_0 = arith.constant 0 : i32
    return %arg0, %c0_i32 : i32, i32
  }
  func.func @transform_1(%arg0: i32) -> (i32, i32) {
    %c0_i32 = arith.constant 0 : i32
    %c0_i32_0 = arith.constant 0 : i32
    %c0_i32_1 = arith.constant 0 : i32
    return %c0_i32, %c0_i32_0 : i32, i32
  }
  func.func @transform_2(%arg0: i32) -> (i32, i32) {
    %c0_i32 = arith.constant 0 : i32
    %c0_i32_0 = arith.constant 0 : i32
    %c0_i32_1 = arith.constant 0 : i32
    return %c0_i32, %c0_i32_0 : i32, i32
  }
  func.func @transform_3(%arg0: i32) -> (i32, i32) {
    %c0_i32 = arith.constant 0 : i32
    %c0_i32_0 = arith.constant 0 : i32
    %c0_i32_1 = arith.constant 0 : i32
    return %c0_i32, %c0_i32_0 : i32, i32
  }
  func.func @transform_4(%arg0: i32) -> (i32, i32) {
    %c0_i32 = arith.constant 0 : i32
    %c0_i32_0 = arith.constant 0 : i32
    %c0_i32_1 = arith.constant 0 : i32
    return %c0_i32, %c0_i32_0 : i32, i32
  }
  func.func @transform_5(%arg0: i32) -> (i32, i32) {
    %c0_i32 = arith.constant 0 : i32
    %c0_i32_0 = arith.constant 0 : i32
    %c0_i32_1 = arith.constant 0 : i32
    return %c0_i32, %c0_i32_0 : i32, i32
  }
  func.func @transform_6(%arg0: i32) -> (i32, i32) {
    %c0_i32 = arith.constant 0 : i32
    %c0_i32_0 = arith.constant 0 : i32
    %c0_i32_1 = arith.constant 0 : i32
    return %c0_i32, %c0_i32_0 : i32, i32
  }
  func.func @transform_7(%arg0: i32) -> (i32, i32) {
    %c0_i32 = arith.constant 0 : i32
    %c0_i32_0 = arith.constant 0 : i32
    %c0_i32_1 = arith.constant 0 : i32
    return %c0_i32, %c0_i32_0 : i32, i32
  }
  func.func @transform_8(%arg0: i32) -> (i32, i32) {
    %c0_i32 = arith.constant 0 : i32
    %c0_i32_0 = arith.constant 0 : i32
    %c0_i32_1 = arith.constant 0 : i32
    return %c0_i32, %c0_i32_0 : i32, i32
  }
  func.func @transform_9(%arg0: i32) -> (i32, i32) {
    %c0_i32 = arith.constant 0 : i32
    %c0_i32_0 = arith.constant 0 : i32
    return %arg0, %c0_i32 : i32, i32
  }
}

</mosaic_0001>

<bundles_post_ra>
// kernel: qnetwork_forward.1
= control target key start
LH: loop header
LB: loop body
LE: loop exit
PB: predicated region body
PF: predicated region fallthrough
CT: control target
= control target key end

     0   :  { %vm42_vm0 = vcmask 64512   ;;  %v537_v2 = vmov 0.0   ;;  %vm538_vm1 = vmmov 0   ;;  %s732_s0 = inlined_call_operand.vmem [shape: f32[2,8], index: 0, kind: input, shape index: {}]   ;;  %s733_s1 = inlined_call_operand.vmem [shape: f32[8,128], index: 1, kind: input, shape index: {}]   ;;  %s734_s2 = inlined_call_operand.vmem [shape: f32[1,128], index: 2, kind: input, shape index: {}]   ;;  %s735_s3 = inlined_call_operand.vmem [shape: f32[128,64], index: 3, kind: input, shape index: {}]   ;;  %s736_s4 = inlined_call_operand.vmem [shape: f32[1,64], index: 4, kind: input, shape index: {}]   ;;  %s737_s5 = inlined_call_operand.vmem [shape: f32[64,32], index: 5, kind: input, shape index: {}]   ;;  %s738_s6 = inlined_call_operand.vmem [shape: f32[1,32], index: 6, kind: input, shape index: {}]   ;;  %s739_s7 = inlined_call_operand.vmem [shape: f32[32,128], index: 7, kind: input, shape index: {}]   ;;  %s740_s8 = inlined_call_operand.vmem [shape: f32[1,128], index: 8, kind: input, shape index: {}]   ;;  %s741_s9 = inlined_call_operand.hbm [shape: f32[2,4], index: 9, kind: output, shape index: {}]  }
   0x1   :  { %v34_v0 = vld [vmem:[%s733_s1] sm:$0xff]  ;;  %442 = vmatprep.subr.mxu0 %v537_v2  ;;  %444 = vmatprep.mubr.msk.f32.mxu0 %vm538_vm1, %v537_v2  ;;  %v132_v3 = vld [vmem:[%s735_s3 + $0x78] sm:$0xff]  ;;  %v131_v4 = vld [vmem:[%s735_s3 + $0x70] sm:$0xff] }
   0x2   :  { %v33_v1 = vld [vmem:[%s732_s0] sm:$0x3]  ;;  %443 = vmatpush3.msra.mxu0 %v34_v0  ;;  %447 = vmatprep.subr.mxu1 %v537_v2  ;;  %v130_v5 = vld [vmem:[%s735_s3 + $0x68] sm:$0xff] }
   0x3   :  { %445 = vmatmul.mubr.msk.f32.vlgmr.msra.gmra.mxu0 %vm42_vm0, %v33_v1  ;;  %448 = vmatpush3.msra.mxu1 %v132_v3 }
   0x4   :  { %449 = vmatprep.subr.mxu1 %v537_v2  ;;  %479 = vmatprep.mubr.msk.f32.mxu1 %vm538_vm1, %v537_v2 }
   0x5   :  { %450 = vmatpush3.msra.mxu1 %v131_v4  ;;  %482 = vmatprep.subr.mxu0 %v537_v2 }
   0x6   :  { %14 = vsyncpa [#allocation3], 0  ;;  %451 = vmatprep.subr.mxu1 %v537_v2  ;;  %v129_v6 = vld [vmem:[%s735_s3 + $0x60] sm:$0xff]  ;;  %498 = vmatprep.mubr.msk.f32.mxu0 %vm538_vm1, %v537_v2  ;;  %v128_v7 = vld [vmem:[%s735_s3 + $0x58] sm:$0xff]  ;;  %vm226_vm2 = vcmask 523264   ;;  %vm312_vm3 = vcmask 261120  }
   0x7   :  { %452 = vmatpush3.msra.mxu1 %v130_v5  ;;  %v127_v8 = vld [vmem:[%s735_s3 + $0x50] sm:$0xff]  ;;  %v126_v9 = vld [vmem:[%s735_s3 + $0x48] sm:$0xff]  ;;  %v125_v10 = vld [vmem:[%s735_s3 + $0x40] sm:$0xff]  ;;  %s539_s25 = smov [#allocation2]   ;;  %vm386_vm4 = vcmask 25600  }
   0x8   :  { %453 = vmatprep.subr.mxu1 %v537_v2  ;;  %v124_v11 = vld [vmem:[%s735_s3 + $0x38] sm:$0xff]  ;;  %v123_v12 = vld [vmem:[%s735_s3 + $0x30] sm:$0xff]  ;;  %v122_v13 = vld [vmem:[%s735_s3 + $0x28] sm:$0xff] }
   0x9   :  { %454 = vmatpush3.msra.mxu1 %v129_v6  ;;  %v121_v14 = vld [vmem:[%s735_s3 + $0x20] sm:$0xff]  ;;  %v120_v15 = vld [vmem:[%s735_s3 + $0x18] sm:$0xff]  ;;  %v119_v16 = vld [vmem:[%s735_s3 + $0x10] sm:$0xff] }
   0xa   :  { %455 = vmatprep.subr.mxu1 %v537_v2  ;;  %v118_v17 = vld [vmem:[%s735_s3 + $0x8] sm:$0xff]  ;;  %v117_v18 = vld [vmem:[%s735_s3] sm:$0xff]  ;;  %v218_v19 = vld [vmem:[%s737_s5 + $0x38] sm:$0xff]  ;;  %s394_s3 = sshll.u32 %s539_s25, 4  ;;  %s395_s3 = int_to_ptr.vmem [resolvable:$true] %s394_s3 }
   0xb   :  { %456 = vmatpush3.msra.mxu1 %v128_v7  ;;  %v217_v20 = vld [vmem:[%s737_s5 + $0x30] sm:$0xff]  ;;  %483 = vmatpush3.msra.mxu0 %v218_v19  ;;  %v216_v21 = vld [vmem:[%s737_s5 + $0x28] sm:$0xff]  ;;  %v215_v22 = vld [vmem:[%s737_s5 + $0x20] sm:$0xff]  ;;  %p520_p1 = scmp.lt.s32.totalorder %s395_s3, %s395_s3 }
   0xc   :  { %457 = vmatprep.subr.mxu1 %v537_v2  ;;  %484 = vmatprep.subr.mxu0 %v537_v2  ;;  %v214_v23 = vld [vmem:[%s737_s5 + $0x18] sm:$0xff]  ;;  %v402_v24 = vld [vmem:[%s734_s2] ss:$0 sm:$0xff]  ;;  %v213_v29 = vld [vmem:[%s737_s5 + $0x10] sm:$0xff] }
   0xd   :  { %458 = vmatpush3.msra.mxu1 %v127_v8  ;;  %485 = vmatpush3.msra.mxu0 %v217_v20  ;;  %v212_v30 = vld [vmem:[%s737_s5 + $0x8] sm:$0xff]  ;;  %v211_v31 = vld [vmem:[%s737_s5] sm:$0xff]  ;;  %v304_v37 = vld [vmem:[%s739_s7 + $0x18] sm:$0xff] }
   0xe   :  { %459 = vmatprep.subr.mxu1 %v537_v2  ;;  %486 = vmatprep.subr.mxu0 %v537_v2  ;;  %v404_v32 = vld [vmem:[%s736_s4] ss:$0 sm:$0xff]  ;;  %v303_v38 = vld [vmem:[%s739_s7 + $0x10] sm:$0xff]  ;;  %v302_v39 = vld [vmem:[%s739_s7 + $0x8] sm:$0xff] }
   0xf   :  { %460 = vmatpush3.msra.mxu1 %v126_v9  ;;  %487 = vmatpush3.msra.mxu0 %v216_v21  ;;  %v301_v40 = vld [vmem:[%s739_s7] sm:$0xff]  ;;  %s515_s7 = scalar_lea.vmem %s395_s3, 32 }
  0x10   :  { %461 = vmatprep.subr.mxu1 %v537_v2  ;;  %488 = vmatprep.subr.mxu0 %v537_v2  ;;  %v405_v41 = vld [vmem:[%s738_s6] ss:$0 sm:$0xff]  ;;  %p516_p0 = scmp.ne.s32.totalorder %s395_s3, %s515_s7  ;;  %p521_p2 = scmp.lt.s32.totalorder %s515_s7, %s515_s7 }
  0x11   :  { %462 = vmatpush3.msra.mxu1 %v125_v10  ;;  %489 = vmatpush3.msra.mxu0 %v215_v22  ;;  %v407_v46 = vld [vmem:[%s740_s8] ss:$0 sm:$0xff] }
  0x12   :  { %463 = vmatprep.subr.mxu1 %v537_v2  ;;  %490 = vmatprep.subr.mxu0 %v537_v2  ;;  %p522_p3 = por %p521_p2, %p520_p1 }
  0x13   :  { %464 = vmatpush3.msra.mxu1 %v124_v11  ;;  %491 = vmatpush3.msra.mxu0 %v214_v23 }
  0x14   :  { %465 = vmatprep.subr.mxu1 %v537_v2  ;;  %492 = vmatprep.subr.mxu0 %v537_v2  ;;  %p523_p4 = pnand %p522_p3, %p516_p0 }
  0x15   :  { %466 = vmatpush3.msra.mxu1 %v123_v12  ;;  %493 = vmatpush3.msra.mxu0 %v213_v29 }
  0x16   :  { %467 = vmatprep.subr.mxu1 %v537_v2  ;;  %494 = vmatprep.subr.mxu0 %v537_v2 }
  0x17   :  { %468 = vmatpush3.msra.mxu1 %v122_v13  ;;  %495 = vmatpush3.msra.mxu0 %v212_v30 }
  0x18   :  { %469 = vmatprep.subr.mxu1 %v537_v2  ;;  %496 = vmatprep.subr.mxu0 %v537_v2 }
  0x19   :  { %470 = vmatpush3.msra.mxu1 %v121_v14  ;;  %497 = vmatpush3.msra.mxu0 %v211_v31 }
  0x1a   :  { %471 = vmatprep.subr.mxu1 %v537_v2  ;;  %501 = vmatprep.subr.mxu0 %v537_v2 }
  0x1b   :  { %472 = vmatpush3.msra.mxu1 %v120_v15 }
  0x1c   :  { %473 = vmatprep.subr.mxu1 %v537_v2 }
  0x1d   :  { %474 = vmatpush3.msra.mxu1 %v119_v16 }
  0x1e   :  { %475 = vmatprep.subr.mxu1 %v537_v2 }
  0x1f   :  { %476 = vmatpush3.msra.mxu1 %v118_v17 }
  0x20   :  { %477 = vmatprep.subr.mxu1 %v537_v2 }
  0x21   :  { %478 = vmatpush3.msra.mxu1 %v117_v18 }
  0xc3   :  { %v112_v25 = vpop.f32.mrf.mxu0 }
  0xc4   :  { %v113_v26 = vadd.f32 %v402_v24, %v112_v25 }
  0xc5   :  { %v446_v27 = vpop.f32.mrf.mxu0 }
  0xc6   :  { %v116_v28 = vmax.f32 %v113_v26, 0.0 }
  0xc8   :  { %480 = vmatmul.mubr.f32.vlgmr.msra.gmra.mxu1 %v116_v28 }
 0x188   :  { %v206_v33 = vpop.f32.mrf.mxu1 }
 0x189   :  { %v207_v34 = vadd.f32 %v404_v32, %v206_v33 }
 0x18a   :  { %v481_v35 = vpop.f32.mrf.mxu1 }
 0x18b   :  { %v210_v36 = vmax.f32 %v207_v34, 0.0 }
 0x18d   :  { %499 = vmatmul.mubr.msk.f32.vlgmr.msra.gmra.mxu0 %vm226_vm2, %v210_v36 }
 0x18e   :  { %502 = vmatpush3.msra.mxu0 %v304_v37  ;;  %509 = vmatprep.mubr.msk.f32.mxu0 %vm538_vm1, %v537_v2 }
 0x18f   :  { %503 = vmatprep.subr.mxu0 %v537_v2 }
 0x190   :  { %504 = vmatpush3.msra.mxu0 %v303_v38 }
 0x191   :  { %505 = vmatprep.subr.mxu0 %v537_v2 }
 0x192   :  { %506 = vmatpush3.msra.mxu0 %v302_v39 }
 0x193   :  { %507 = vmatprep.subr.mxu0 %v537_v2 }
 0x194   :  { %508 = vmatpush3.msra.mxu0 %v301_v40 }
 0x24d   :  { %v296_v42 = vpop.f32.mrf.mxu0 }
 0x24e   :  { %v297_v43 = vadd.f32 %v405_v41, %v296_v42 }
 0x24f   :  { %v500_v44 = vpop.f32.mrf.mxu0 }
 0x250   :  { %v300_v45 = vmax.f32 %v297_v43, 0.0 }
 0x252   :  { %510 = vmatmul.mubr.msk.f32.vlgmr.msra.gmra.mxu0 %vm312_vm3, %v300_v45 }
 0x312   :  { %v382_v47 = vpop.f32.mrf.mxu0 }
 0x313   :  { %v383_v48 = vadd.f32 %v407_v46, %v382_v47 }
 0x314   :  { %v511_v49 = vpop.f32.mrf.mxu0 }
 0x315   :  { %387 = vst.msk [vmem:[#allocation2] sm:$0x3] %vm386_vm4, %v383_v48 }
 0x316   :  { %526 = shalt.err (!%p523_p4)
}
 0x317   :  { %397 = dma.vmem_to_hbm [thread:$0]  %s395_s3, 32, %s741_s9, [#allocation3]  }
 0x318   :  { %535 = dma.done.wait [#allocation3], 32  }
 0x319   :  { %536 = vsyncadd [#allocation3], 4294967264 }
 0x31a   :  { %401 = vsyncpa [#allocation3], 1 }

</bundles_post_ra>
